<compile_context>
chip_gen: v6e
topology: v6e:2x2x1
jax: 0.10.0
libtpu: 0.0.40
codegen_flags: <defaults>
</compile_context>

<pallas_src>
import jax
import jax.numpy as jnp
from jax.experimental import pallas as pl
from jax.experimental.pallas import tpu as pltpu


_TB_MAX = 65536          # lanes per batch tile; double-buffered in+out ~= 8 MiB VMEM
_HIGHEST = jax.lax.Precision.HIGHEST


def _round_up(n, m):
    return ((n + m - 1) // m) * m


def _choose_tile(batch):
    """Pick (tile_lanes, padded_batch).

    - tile is a multiple of 128 (lane-dense, unmasked stores)
    - tile <= _TB_MAX so double-buffered VMEM stays ~8 MiB on every generation
    - for non-tiny batches use an even number (>=2) of tiles so v7x can shard
      the "parallel" batch axis across both TensorCores.
    """
    b128 = _round_up(max(batch, 1), 128)
    if b128 <= 256:                      # tiny batch: one tile, nothing to shard
        return b128, b128
    n_tiles = max(2, -(-b128 // _TB_MAX))
    n_tiles = _round_up(n_tiles, 2)      # even -> both v7x TCs stay busy
    tb = _round_up(-(-b128 // n_tiles), 128)
    b_pad = _round_up(b128, tb)
    return tb, b_pad


def _sum_diff_kernel(params_ref, x_ref, out_ref):
    # params_ref: (8, 128) packed parameters (single resident DMA):
    #   [0:4, 0:4]  Wc      conv weight           (out_ch=4, k=4)
    #   [4:6, 0:4]  Wfc_x   fc weight, data half  (2, 4)
    #   [6:8, 0:4]  Wfc_c   fc weight, conv half  (2, 4)
    #   [0:4, 4:5]  bc      conv bias  (column)
    #   [4:6, 4:5]  bfc     fc bias    (column)
    # x_ref:   (4, TB)   input, (features x batch) lane-dense layout
    # out_ref: (2, TB)   output, lane-dense
    p = params_ref[...]
    w_c = p[0:4, 0:4]
    w_fc_x = p[4:6, 0:4]
    w_fc_c = p[6:8, 0:4]
    b_c = p[0:4, 4:5]
    b_fc = p[4:6, 4:5]

    x = x_ref[...]                                                    # (4, TB)

    conv = jnp.maximum(
        jnp.dot(w_c, x, precision=_HIGHEST,
                preferred_element_type=jnp.float32) + b_c, 0.0)       # (4, TB)

    out = (jnp.dot(w_fc_c, conv, precision=_HIGHEST,
                   preferred_element_type=jnp.float32)
           + jnp.dot(w_fc_x, x, precision=_HIGHEST,
                     preferred_element_type=jnp.float32)
           + b_fc)                                                    # (2, TB)
    out_ref[...] = jnp.maximum(out, 0.0)


def _pack_params(conv_w, conv_b, fc_w, fc_b):
    """Pack all parameters into a single (8, 128) f32 block (one DMA)."""
    wc = conv_w.reshape(4, 4).astype(jnp.float32)         # (out_ch, k)
    wfc_c = fc_w[:, :4].astype(jnp.float32)               # (2, 4) acts on conv
    wfc_x = fc_w[:, 4:].astype(jnp.float32)               # (2, 4) acts on data
    params = jnp.zeros((8, 128), jnp.float32)
    params = params.at[0:4, 0:4].set(wc)
    params = params.at[4:6, 0:4].set(wfc_x)
    params = params.at[6:8, 0:4].set(wfc_c)
    params = params.at[0:4, 4].set(conv_b.astype(jnp.float32))
    params = params.at[4:6, 4].set(fc_b.astype(jnp.float32))
    return params


def sum_and_diff_feature_major(x_fm, conv_w, conv_b, fc_w, fc_b):
    """Fast path: x_fm is (4, B) feature-major f32; returns (2, B) feature-major.

    No wrapper-side layout passes at all when B is a multiple of 128.
    """
    _, batch = x_fm.shape
    tb, b_pad = _choose_tile(batch)

    x_in = x_fm.astype(jnp.float32)
    if b_pad != batch:
        x_in = jnp.pad(x_in, ((0, 0), (0, b_pad - batch)))            # (4, B_pad)

    params = _pack_params(conv_w, conv_b, fc_w, fc_b)                 # (8, 128)

    out_fm = pl.pallas_call(
        _sum_diff_kernel,
        out_shape=jax.ShapeDtypeStruct((2, b_pad), jnp.float32),
        grid=(b_pad // tb,),
        in_specs=[
            pl.BlockSpec((8, 128), lambda i: (0, 0)),    # params stay resident
            pl.BlockSpec((4, tb), lambda i: (0, i)),     # batch tile of input
        ],
        out_specs=pl.BlockSpec((2, tb), lambda i: (0, i)),
        compiler_params=pltpu.CompilerParams(
            dimension_semantics=("parallel",),           # v7x: shard over 2 TCs
            vmem_limit_bytes=32 * 1024 * 1024,           # headroom on v5e, <= v7x physical
        ),
    )(params, x_in)

    if b_pad != batch:
        out_fm = out_fm[:, :batch]
    return out_fm


def sum_and_diff_forward(data, conv_w, conv_b, fc_w, fc_b):
    """data: (B, 1, 4) f32.  Returns (B, 1, 2) f32, matching the PyTorch module.

    Keeps exactly one layout pass each way to honour the PyTorch (batch-major)
    contract; layout-free callers should use sum_and_diff_feature_major.
    """
    batch = data.shape[0]
    x_fm = data.reshape(batch, 4).astype(jnp.float32).T               # (4, B)
    out_fm = sum_and_diff_feature_major(x_fm, conv_w, conv_b, fc_w, fc_b)
    return out_fm.T.reshape(batch, 1, 2)


def _reference_forward(data, conv_w, conv_b, fc_w, fc_b):
    """Pure-JAX reference mirroring the PyTorch semantics (full f32 precision)."""
    batch = data.shape[0]
    x = data.reshape(batch, 4).astype(jnp.float32)
    wc = conv_w.reshape(4, 4).astype(jnp.float32)
    conv = jnp.maximum(
        jnp.dot(x, wc.T, precision=_HIGHEST) + conv_b, 0.0)           # (B, 4)
    combined = jnp.concatenate([conv, x], axis=1)                     # (B, 8)
    out = jnp.maximum(
        jnp.dot(combined, fc_w.T, precision=_HIGHEST) + fc_b, 0.0)    # (B, 2)
    return out.reshape(batch, 1, 2)


if __name__ == "__main__":
    # Deterministic parameter / input init (PyTorch-style uniform bounds).
    key = jax.random.PRNGKey(0)
    k1, k2, k3, k4, kx, ky = jax.random.split(key, 6)
    conv_bound = 1.0 / jnp.sqrt(1.0 * 4.0)       # 1/sqrt(in_ch * kernel)
    fc_bound = 1.0 / jnp.sqrt(8.0)
    conv_w = jax.random.uniform(k1, (4, 1, 4), jnp.float32, -conv_bound, conv_bound)
    conv_b = jax.random.uniform(k2, (4,), jnp.float32, -conv_bound, conv_bound)
    fc_w = jax.random.uniform(k3, (2, 8), jnp.float32, -fc_bound, fc_bound)
    fc_b = jax.random.uniform(k4, (2,), jnp.float32, -fc_bound, fc_bound)

    # Small example input implied by Conv1d(1,4,4)+Linear(8,2): (B, 1, 4), B=2.
    data = jax.random.normal(kx, (2, 1, 4), jnp.float32)

    out = sum_and_diff_forward(data, conv_w, conv_b, fc_w, fc_b)
    out = jax.block_until_ready(out)
    ref = _reference_forward(data, conv_w, conv_b, fc_w, fc_b)
    assert out.shape == (2, 1, 2)
    assert jnp.allclose(out, ref, atol=1e-5, rtol=1e-5), (out, ref)

    # Extra coverage: ragged batch that exercises padding + a 2-step grid.
    data2 = jax.random.normal(ky, (300, 1, 4), jnp.float32)
    out2 = jax.block_until_ready(
        sum_and_diff_forward(data2, conv_w, conv_b, fc_w, fc_b))
    ref2 = _reference_forward(data2, conv_w, conv_b, fc_w, fc_b)
    assert out2.shape == (300, 1, 2)
    assert jnp.allclose(out2, ref2, atol=1e-5, rtol=1e-5)

    print("KERNEL_OK")
</pallas_src>

<mosaic_0001>
module attributes {stable_mosaic.version = 11 : i64} {
  func.func @_sum_diff_kernel(%arg0: i32, %arg1: memref<8x128xf32, #tpu.memory_space<vmem>>, %arg2: memref<4x128xf32, #tpu.memory_space<vmem>>, %arg3: memref<2x128xf32, #tpu.memory_space<vmem>>) attributes {dimension_semantics = [#tpu.dimension_semantics<parallel>], iteration_bounds = array<i64: 1>, scalar_prefetch = 0 : i64, scratch_operands = 0 : i64, tpu.core_type = #tpu.core_type<tc>, window_params = [{pipeline_mode = #tpu.pipeline_mode<synchronous>, transform_indices = @transform_0, window_bounds = array<i64: 8, 128>}, {transform_indices = @transform_1, window_bounds = array<i64: 4, 128>}, {transform_indices = @transform_2, window_bounds = array<i64: 2, 128>}]} {
    %c0 = arith.constant 0 : index
    %c0_0 = arith.constant 0 : index
    %0 = vector.load %arg1[%c0, %c0_0] : memref<8x128xf32, #tpu.memory_space<vmem>>, vector<8x128xf32>
    %1 = vector.extract_strided_slice %0 {offsets = [0, 0], sizes = [4, 4], strides = [1, 1]} : vector<8x128xf32> to vector<4x4xf32>
    %2 = vector.extract_strided_slice %0 {offsets = [4, 0], sizes = [2, 4], strides = [1, 1]} : vector<8x128xf32> to vector<2x4xf32>
    %3 = vector.extract_strided_slice %0 {offsets = [6, 0], sizes = [2, 4], strides = [1, 1]} : vector<8x128xf32> to vector<2x4xf32>
    %4 = vector.extract_strided_slice %0 {offsets = [0, 4], sizes = [4, 1], strides = [1, 1]} : vector<8x128xf32> to vector<4x1xf32>
    %5 = vector.extract_strided_slice %0 {offsets = [4, 4], sizes = [2, 1], strides = [1, 1]} : vector<8x128xf32> to vector<2x1xf32>
    %c0_1 = arith.constant 0 : index
    %c0_2 = arith.constant 0 : index
    %6 = vector.load %arg2[%c0_1, %c0_2] : memref<4x128xf32, #tpu.memory_space<vmem>>, vector<4x128xf32>
    %cst = arith.constant dense<0.000000e+00> : vector<4x128xf32>
    %7 = tpu.matmul %1, %6, %cst {dimension_numbers = #tpu.dot_dimension_numbers<[1], [0], [0], [1], [0, 0, 1, 1], [], []>, precision = #tpu.contract_precision<fp32>} : vector<4x4xf32>, vector<4x128xf32>, vector<4x128xf32> -> vector<4x128xf32>
    %8 = vector.broadcast %4 : vector<4x1xf32> to vector<4x128xf32>
    %9 = arith.addf %7, %8 : vector<4x128xf32>
    %cst_3 = arith.constant 0.000000e+00 : f32
    %10 = vector.broadcast %cst_3 : f32 to vector<4x128xf32>
    %11 = arith.maximumf %9, %10 : vector<4x128xf32>
    %cst_4 = arith.constant dense<0.000000e+00> : vector<2x128xf32>
    %12 = tpu.matmul %3, %11, %cst_4 {dimension_numbers = #tpu.dot_dimension_numbers<[1], [0], [0], [1], [0, 0, 1, 1], [], []>, precision = #tpu.contract_precision<fp32>} : vector<2x4xf32>, vector<4x128xf32>, vector<2x128xf32> -> vector<2x128xf32>
    %cst_5 = arith.constant dense<0.000000e+00> : vector<2x128xf32>
    %13 = tpu.matmul %2, %6, %cst_5 {dimension_numbers = #tpu.dot_dimension_numbers<[1], [0], [0], [1], [0, 0, 1, 1], [], []>, precision = #tpu.contract_precision<fp32>} : vector<2x4xf32>, vector<4x128xf32>, vector<2x128xf32> -> vector<2x128xf32>
    %14 = arith.addf %12, %13 : vector<2x128xf32>
    %15 = vector.broadcast %5 : vector<2x1xf32> to vector<2x128xf32>
    %16 = arith.addf %14, %15 : vector<2x128xf32>
    %cst_6 = arith.constant 0.000000e+00 : f32
    %17 = vector.broadcast %cst_6 : f32 to vector<2x128xf32>
    %18 = arith.maximumf %16, %17 : vector<2x128xf32>
    %c0_7 = arith.constant 0 : index
    %c0_8 = arith.constant 0 : index
    %19 = vector.load %arg3[%c0_7, %c0_8] : memref<2x128xf32, #tpu.memory_space<vmem>>, vector<2x128xf32>
    tpu.vector_store %arg3[%c0_7, %c0_8], %18 {strides = array<i32>} : memref<2x128xf32, #tpu.memory_space<vmem>>, vector<2x128xf32>,
    return
  }
  func.func @transform_0(%arg0: i32) -> (i32, i32) {
    %c0_i32 = arith.constant 0 : i32
    %c0_i32_0 = arith.constant 0 : i32
    %c0_i32_1 = arith.constant 0 : i32
    return %c0_i32, %c0_i32_0 : i32, i32
  }
  func.func @transform_1(%arg0: i32) -> (i32, i32) {
    %c0_i32 = arith.constant 0 : i32
    %c0_i32_0 = arith.constant 0 : i32
    return %c0_i32, %arg0 : i32, i32
  }
  func.func @transform_2(%arg0: i32) -> (i32, i32) {
    %c0_i32 = arith.constant 0 : i32
    %c0_i32_0 = arith.constant 0 : i32
    return %c0_i32, %arg0 : i32, i32
  }
}

</mosaic_0001>

<bundles_post_ra>
// kernel: tpu_custom_call.1
= control target key start
LH: loop header
LB: loop body
LE: loop exit
PB: predicated region body
PF: predicated region fallthrough
CT: control target
= control target key end

     0   :  { %7 = vsyncpa [#allocation3], 0  ;;  %s1717_s0 = inlined_call_operand.hbm [shape: f32[8,128], index: 0, kind: input, shape index: {}]   ;;  %s1718_s1 = inlined_call_operand.hbm [shape: f32[4,128], index: 1, kind: input, shape index: {}]   ;;  %s1719_s2 = inlined_call_operand.hbm [shape: f32[2,128], index: 2, kind: output, shape index: {}]  }
   0x1   :  { %8 = vsyncpa [#allocation6], 0 }
   0x2   :  { %9 = vsyncpa [#allocation4], 0  ;;  %s1618_s9 = smov [#allocation2]   ;;  %s1619_s11 = smov [#allocation5]  }
   0x3   :  { %s16_s10 = sshll.u32 %s1618_s9, 4  ;;  %s26_s12 = sshll.u32 %s1619_s11, 4  ;;  %s17_s10 = int_to_ptr.vmem [resolvable:$true] %s16_s10  ;;  %s27_s12 = int_to_ptr.vmem [resolvable:$true] %s26_s12 }
   0x4   :  { %s1560_s13 = scalar_lea.vmem %s17_s10, 128  ;;  %p1565_p1 = scmp.lt.s32.totalorder %s17_s10, %s17_s10 }
   0x5   :  { %p1561_p0 = scmp.ne.s32.totalorder %s17_s10, %s1560_s13  ;;  %p1566_p2 = scmp.lt.s32.totalorder %s1560_s13, %s1560_s13 }
   0x7   :  { %p1567_p3 = por %p1566_p2, %p1565_p1 }
   0x9   :  { %p1568_p4 = pnand %p1567_p3, %p1561_p0 }
   0xb   :  { %1571 = shalt.err (!%p1568_p4)
}
   0xc   :  { %19 = dma.hbm_to_vmem [thread:$0]  %s1717_s0, 128, %s17_s10, [#allocation3]  }
   0xd   :  { %s1580_s16 = scalar_lea.vmem %s27_s12, 64  ;;  %p1585_p6 = scmp.lt.s32.totalorder %s27_s12, %s27_s12 }
   0xe   :  { %p1581_p5 = scmp.ne.s32.totalorder %s27_s12, %s1580_s16  ;;  %p1586_p7 = scmp.lt.s32.totalorder %s1580_s16, %s1580_s16 }
  0x10   :  { %p1587_p8 = por %p1586_p7, %p1585_p6 }
  0x12   :  { %p1588_p9 = pnand %p1587_p8, %p1581_p5 }
  0x14   :  { %1591 = shalt.err (!%p1588_p9)
}
  0x15   :  { %29 = dma.hbm_to_vmem [thread:$0]  %s1718_s1, 64, %s27_s12, [#allocation6]  }
  0x16   :  { %1612 = dma.done.wait [#allocation3], 128  }
  0x17   :  { %1613 = vsyncadd [#allocation3], 4294967168 }
  0x18   :  { %1614 = dma.done.wait [#allocation6], 64  }
  0x19   :  { %1615 = vsyncadd [#allocation6], 4294967232  ;;  %v1620_v0 = vmov 0.0   ;;  %vm1621_vm0 = vmmov 0   ;;  %v1622_v1 = vmov 4   ;;  %vm46_vm1 = vcmask 1043456  }
  0x1a   :  { %1455 = vmatprep.subr.mxu0 %v1620_v0  ;;  %1457 = vmatprep.mubr.msk.f32.mxu0 %vm1621_vm0, %v1620_v0  ;;  %vm43_vm2 = vcmask 31744   ;;  %v37_v2 = vld [vmem:[#allocation5] sm:$0xf]  ;;  %v1651_v3 = vld [vmem:[#allocation2] sm:$0xff]  ;;  %s1623_s0 = smov [#allocation7]  }
  0x1b   :  { %1460 = vmatprep.subr.mxu1 %v1620_v0  ;;  %1462 = vmatprep.mubr.msk.f32.mxu1 %vm1621_vm0, %v1620_v0  ;;  %v48_v4 = vsel %vm46_vm1, %v37_v2, 0  ;;  %v44_v5 = vsel %vm43_vm2, %v1651_v3, 0  ;;  %v497_v16 = vrot.slane %v1651_v3, 4  ;;  %v946_v23 = vrot.slane %v1651_v3, 6  ;;  %s1409_s1 = sshll.u32 %s1623_s0, 4  ;;  %s1410_s1 = int_to_ptr.vmem [resolvable:$true] %s1409_s1 }
  0x1c   :  { %1551 = vset.pattern.permute.xlu0 %v1622_v1  ;;  %v81_v6 = vand.u32 4294901760, %v48_v4  ;;  %v116_v7 = vand.u32 4294901760, %v44_v5  ;;  %s1592_s19 = scalar_lea.vmem %s1410_s1, 32  ;;  %p1597_p11 = scmp.lt.s32.totalorder %s1410_s1, %s1410_s1 }
  0x1d   :  { %40 = vperm.xlu0 %1551, %v1651_v3   ;;  %v498_v17 = vsel %vm43_vm2, %v497_v16, 0  ;;  %v947_v24 = vsel %vm43_vm2, %v946_v23, 0  ;;  %p1593_p10 = scmp.ne.s32.totalorder %s1410_s1, %s1592_s19  ;;  %p1598_p12 = scmp.lt.s32.totalorder %s1592_s19, %s1592_s19 }
  0x1e   :  { %1456 = vmatpush3.msra.mxu0 %v81_v6  ;;  %v117_v8 = vsub.f32 %v44_v5, %v116_v7  ;;  %v158_v9 = vsub.f32 %v48_v4, %v81_v6  ;;  %v566_v18 = vand.u32 4294901760, %v498_v17  ;;  %v1018_v26 = vand.u32 4294901760, %v947_v24 }
  0x1f   :  { %1465 = vmatprep.subr.mxu0 %v1620_v0  ;;  %p1599_p13 = por %p1598_p12, %p1597_p11 }
  0x20   :  { %v118_v10 = vand.u32 4294901760, %v117_v8  ;;  %v159_v11 = vand.u32 4294901760, %v158_v9  ;;  %v567_v19 = vsub.f32 %v498_v17, %v566_v18  ;;  %v1019_v33 = vsub.f32 %v947_v24, %v1018_v26 }
  0x21   :  { %p1600_p0 = pnand %p1599_p13, %p1593_p10 }
  0x22   :  { %v119_v12 = vsub.f32 %v117_v8, %v118_v10  ;;  %v160_v13 = vsub.f32 %v158_v9, %v159_v11  ;;  %v568_v20 = vand.u32 4294901760, %v567_v19  ;;  %v1020_v40 = vand.u32 4294901760, %v1019_v33 }
  0x24   :  { %v120_v14 = vand.u32 4294901760, %v119_v12  ;;  %v161_v15 = vand.u32 4294901760, %v160_v13  ;;  %v569_v21 = vsub.f32 %v567_v19, %v568_v20  ;;  %v1021_v47 = vsub.f32 %v1019_v33, %v1020_v40 }
  0x26   :  { %1458 = vmatmul.mubr.f32.vlgmr.msra.gmra.mxu0 %v120_v14  ;;  %1461 = vmatpush3.msra.mxu1 %v161_v15  ;;  %v570_v22 = vand.u32 4294901760, %v569_v21  ;;  %v1022_v50 = vand.u32 4294901760, %v1021_v47 }
  0x27   :  { %1463 = vmatmul.mubr.f32.vlgmr.msra.gmra.mxu1 %v116_v7  ;;  %1466 = vmatpush3.msra.mxu0 %v158_v9 }
  0x28   :  { %1467 = vmatprep.mubr.msk.f32.mxu0 %vm1621_vm0, %v1620_v0  ;;  %1470 = vmatprep.subr.mxu1 %v1620_v0 }
  0x29   :  { %1471 = vmatpush3.msra.mxu1 %v81_v6  ;;  %1472 = vmatprep.mubr.msk.f32.mxu1 %vm1621_vm0, %v1620_v0 }
  0x2a   :  { %1468 = vmatmul.mubr.f32.vlgmr.msra.gmra.mxu0 %v117_v8  ;;  %1475 = vmatprep.subr.mxu0 %v1620_v0 }
  0x2b   :  { %1473 = vmatmul.mubr.f32.vlgmr.msra.gmra.mxu1 %v118_v10  ;;  %1476 = vmatpush3.msra.mxu0 %v159_v11 }
  0x2c   :  { %1477 = vmatprep.mubr.msk.f32.mxu0 %vm1621_vm0, %v1620_v0  ;;  %1480 = vmatprep.subr.mxu1 %v1620_v0 }
  0x2d   :  { %1481 = vmatpush3.msra.mxu1 %v81_v6  ;;  %1482 = vmatprep.mubr.msk.f32.mxu1 %vm1621_vm0, %v1620_v0 }
  0x2e   :  { %1478 = vmatmul.mubr.f32.vlgmr.msra.gmra.mxu0 %v116_v7  ;;  %1485 = vmatprep.subr.mxu0 %v1620_v0 }
  0x2f   :  { %1483 = vmatmul.mubr.f32.vlgmr.msra.gmra.mxu1 %v116_v7  ;;  %1486 = vmatpush3.msra.mxu0 %v81_v6 }
  0x30   :  { %1487 = vmatprep.mubr.msk.f32.mxu0 %vm1621_vm0, %v1620_v0  ;;  %1495 = vmatprep.subr.mxu0 %v1620_v0 }
  0x31   :  { %1490 = vmatprep.subr.mxu1 %v1620_v0  ;;  %1492 = vmatprep.mubr.msk.f32.mxu1 %vm1621_vm0, %v1620_v0 }
  0x32   :  { %1491 = vmatpush3.msra.mxu1 %v161_v15  ;;  %1488 = vmatmul.mubr.f32.vlgmr.msra.gmra.mxu0 %v570_v22 }
  0x33   :  { %1500 = vmatprep.subr.mxu1 %v1620_v0  ;;  %1493 = vmatmul.mubr.f32.vlgmr.msra.gmra.mxu1 %v566_v18 }
  0x34   :  { %1501 = vmatpush3.msra.mxu1 %v81_v6  ;;  %1502 = vmatprep.mubr.msk.f32.mxu1 %vm1621_vm0, %v1620_v0 }
  0x35   :  { %1510 = vmatprep.subr.mxu1 %v1620_v0  ;;  %1496 = vmatpush3.msra.mxu0 %v158_v9 }
  0x36   :  { %1497 = vmatprep.mubr.msk.f32.mxu0 %vm1621_vm0, %v1620_v0  ;;  %1505 = vmatprep.subr.mxu0 %v1620_v0 }
  0x37   :  { %1503 = vmatmul.mubr.f32.vlgmr.msra.gmra.mxu1 %v568_v20  ;;  %1498 = vmatmul.mubr.f32.vlgmr.msra.gmra.mxu0 %v567_v19 }
  0x38   :  { %1511 = vmatpush3.msra.mxu1 %v81_v6  ;;  %1512 = vmatprep.mubr.msk.f32.mxu1 %vm1621_vm0, %v1620_v0 }
  0x39   :  { %1520 = vmatprep.subr.mxu1 %v1620_v0  ;;  %1506 = vmatpush3.msra.mxu0 %v159_v11 }
  0x3a   :  { %1507 = vmatprep.mubr.msk.f32.mxu0 %vm1621_vm0, %v1620_v0  ;;  %1515 = vmatprep.subr.mxu0 %v1620_v0 }
  0x3b   :  { %1513 = vmatmul.mubr.f32.vlgmr.msra.gmra.mxu1 %v566_v18  ;;  %1508 = vmatmul.mubr.f32.vlgmr.msra.gmra.mxu0 %v566_v18 }
  0x3c   :  { %1522 = vmatprep.mubr.msk.f32.mxu1 %vm1621_vm0, %v1620_v0  ;;  %1517 = vmatprep.mubr.msk.f32.mxu0 %vm1621_vm0, %v1620_v0 }
  0x98   :  { %v1697_v25 = vpop.permute.xlu0 %40 }
  0xe6   :  { %v122_v27 = vpop.f32.mrf.mxu0 }
  0xe7   :  { %v123_v28 = vadd.f32 %v122_v27, %v1697_v25  ;;  %v198_v29 = vpop.f32.mrf.mxu1 }
  0xe8   :  { %v1459_v30 = vpop.f32.mrf.mxu0 }
  0xe9   :  { %v199_v31 = vadd.f32 %v198_v29, %v123_v28  ;;  %v1464_v32 = vpop.f32.mrf.mxu1 }
  0xea   :  { %v272_v34 = vpop.f32.mrf.mxu0 }
  0xeb   :  { %v273_v35 = vadd.f32 %v272_v34, %v199_v31  ;;  %v346_v36 = vpop.f32.mrf.mxu1 }
  0xec   :  { %v1469_v37 = vpop.f32.mrf.mxu0 }
  0xed   :  { %v347_v38 = vadd.f32 %v346_v36, %v273_v35  ;;  %v1474_v39 = vpop.f32.mrf.mxu1 }
  0xee   :  { %v420_v41 = vpop.f32.mrf.mxu0 }
  0xef   :  { %v421_v42 = vadd.f32 %v420_v41, %v347_v38  ;;  %v492_v43 = vpop.f32.mrf.mxu1 }
  0xf0   :  { %v1479_v44 = vpop.f32.mrf.mxu0 }
  0xf1   :  { %v493_v45 = vadd.f32 %v492_v43, %v421_v42  ;;  %v1484_v46 = vpop.f32.mrf.mxu1 }
  0xf2   :  { %v572_v60 = vpop.f32.mrf.mxu0 }
  0xf3   :  { %v496_v48 = vmax.f32 %v493_v45, 0.0  ;;  %v648_v56 = vpop.f32.mrf.mxu1 }
  0xf4   :  { %v649_v62 = vadd.f32 %v648_v56, %v572_v60  ;;  %v1489_v63 = vpop.f32.mrf.mxu0 }
  0xf5   :  { %v950_v49 = vsel %vm46_vm1, %v496_v48, 0  ;;  %v1494_v57 = vpop.f32.mrf.mxu1 }
  0xf6   :  { %v983_v51 = vand.u32 4294901760, %v950_v49 }
  0xf7   :  { %v796_v58 = vpop.f32.mrf.mxu1  ;;  %v722_v2 = vpop.f32.mrf.mxu0 }
  0xf8   :  { %v1060_v52 = vsub.f32 %v950_v49, %v983_v51  ;;  %1516 = vmatpush3.msra.mxu0 %v983_v51  ;;  %v723_v3 = vadd.f32 %v722_v2, %v649_v62 }
  0xf9   :  { %1518 = vmatmul.mubr.f32.vlgmr.msra.gmra.mxu0 %v1022_v50  ;;  %1525 = vmatprep.subr.mxu0 %v1620_v0  ;;  %v1504_v59 = vpop.f32.mrf.mxu1  ;;  %v1499_v4 = vpop.f32.mrf.mxu0 }
  0xfa   :  { %1526 = vmatpush3.msra.mxu0 %v1060_v52  ;;  %1527 = vmatprep.mubr.msk.f32.mxu0 %vm1621_vm0, %v1620_v0  ;;  %v1061_v53 = vand.u32 4294901760, %v1060_v52  ;;  %v797_v5 = vadd.f32 %v796_v58, %v723_v3 }
  0xfb   :  { %1535 = vmatprep.subr.mxu0 %v1620_v0  ;;  %v942_v61 = vpop.f32.mrf.mxu1  ;;  %v870_v6 = vpop.f32.mrf.mxu0 }
  0xfc   :  { %v1062_v54 = vsub.f32 %v1060_v52, %v1061_v53  ;;  %v871_v7 = vadd.f32 %v870_v6, %v797_v5 }
  0xfd   :  { %1528 = vmatmul.mubr.f32.vlgmr.msra.gmra.mxu0 %v1019_v33  ;;  %v1514_v1 = vpop.f32.mrf.mxu1  ;;  %v1509_v8 = vpop.f32.mrf.mxu0 }
  0xfe   :  { %1536 = vmatpush3.msra.mxu0 %v1061_v53  ;;  %v1063_v55 = vand.u32 4294901760, %v1062_v54  ;;  %1537 = vmatprep.mubr.msk.f32.mxu0 %vm1621_vm0, %v1620_v0  ;;  %v943_v9 = vadd.f32 %v942_v61, %v871_v7 }
 0x100   :  { %1521 = vmatpush3.msra.mxu1 %v1063_v55 }
 0x101   :  { %1523 = vmatmul.mubr.f32.vlgmr.msra.gmra.mxu1 %v1018_v26  ;;  %1530 = vmatprep.subr.mxu1 %v1620_v0 }
 0x102   :  { %1531 = vmatpush3.msra.mxu1 %v983_v51  ;;  %1532 = vmatprep.mubr.msk.f32.mxu1 %vm1621_vm0, %v1620_v0 }
 0x103   :  { %1540 = vmatprep.subr.mxu1 %v1620_v0  ;;  %1538 = vmatmul.mubr.f32.vlgmr.msra.gmra.mxu0 %v1018_v26 }
 0x105   :  { %1533 = vmatmul.mubr.f32.vlgmr.msra.gmra.mxu1 %v1020_v40 }
 0x106   :  { %1541 = vmatpush3.msra.mxu1 %v983_v51  ;;  %1542 = vmatprep.mubr.msk.f32.mxu1 %vm1621_vm0, %v1620_v0 }
 0x109   :  { %1543 = vmatmul.mubr.f32.vlgmr.msra.gmra.mxu1 %v1018_v26  ;;  %v1398_v26 = vrot.slane %v1697_v25, 4 }
 0x1b9   :  { %v1024_v10 = vpop.f32.mrf.mxu0 }
 0x1ba   :  { %v1025_v13 = vadd.f32 %v1024_v10, %v943_v9 }
 0x1bb   :  { %v1519_v0 = vpop.f32.mrf.mxu0 }
 0x1bd   :  { %v1174_v11 = vpop.f32.mrf.mxu0 }
 0x1bf   :  { %v1529_v12 = vpop.f32.mrf.mxu0 }
 0x1c1   :  { %v1100_v14 = vpop.f32.mrf.mxu1 }
 0x1c2   :  { %v1101_v15 = vadd.f32 %v1100_v14, %v1025_v13 }
 0x1c3   :  { %v1524_v16 = vpop.f32.mrf.mxu1  ;;  %v1322_v17 = vpop.f32.mrf.mxu0 }
 0x1c4   :  { %v1175_v18 = vadd.f32 %v1174_v11, %v1101_v15 }
 0x1c5   :  { %v1248_v19 = vpop.f32.mrf.mxu1  ;;  %v1539_v20 = vpop.f32.mrf.mxu0 }
 0x1c6   :  { %v1249_v21 = vadd.f32 %v1248_v19, %v1175_v18 }
 0x1c7   :  { %v1534_v22 = vpop.f32.mrf.mxu1 }
 0x1c8   :  { %v1323_v23 = vadd.f32 %v1322_v17, %v1249_v21 }
 0x1c9   :  { %v1394_v24 = vpop.f32.mrf.mxu1 }
 0x1ca   :  { %v1395_v27 = vadd.f32 %v1394_v24, %v1323_v23 }
 0x1cb   :  { %v1544_v28 = vpop.f32.mrf.mxu1 }
 0x1cc   :  { %v1400_v29 = vadd.f32 %v1398_v26, %v1395_v27 }
 0x1ce   :  { %v1401_v30 = vmax.f32 %v1400_v29, 0.0 }
 0x1d0   :  { %1402 = vst [vmem:[#allocation7] sm:$0x3] %v1401_v30 }
 0x1d1   :  { %1603 = shalt.err (!%p1600_p0)
}
 0x1d2   :  { %1412 = dma.vmem_to_hbm [thread:$0]  %s1410_s1, 32, %s1719_s2, [#allocation4]  }
 0x1d3   :  { %1616 = dma.done.wait [#allocation4], 32  }
 0x1d4   :  { %1617 = vsyncadd [#allocation4], 4294967264 }
 0x1d5   :  { %1416 = vsyncpa [#allocation3], 1 }
 0x1d6   :  { %1417 = vsyncpa [#allocation6], 1 }
 0x1d7   :  { %1418 = vsyncpa [#allocation4], 1 }

</bundles_post_ra>
